<compile_context>
chip_gen: v6e
topology: v6e:2x2x1
jax: 0.10.0
libtpu: 0.0.40
codegen_flags: <defaults>
</compile_context>

<pallas_src>
from functools import partial

import jax
import jax.numpy as jnp
from jax.experimental import pallas as pl
from jax.experimental.pallas import tpu as pltpu


_VMEM_LIMIT_BYTES = 48 * 1024 * 1024   # safe scoped limit on v5e/v6e/v7x
_VMEM_PLAN_BUDGET = 40 * 1024 * 1024   # footprint we plan double-buffered tiles against


# ----------------------------- kernels ------------------------------------- #

def head_kernel_resident(x_ref, w_ref, b_ref, o_ref):
    # Single reduction step: whole weight resident in VMEM, no accumulator scratch.
    # x_ref : (tm, F)   w_ref : (F, Kp)   b_ref : (1, Kp)   o_ref : (tm, Kp)
    o_ref[...] = (jnp.dot(x_ref[...], w_ref[...],
                          preferred_element_type=jnp.float32)
                  + b_ref[...]).astype(o_ref.dtype)


def head_kernel_tiled(x_ref, w_ref, b_ref, o_ref, acc_ref):
    # Fallback for large F/Kp. Grid = (M tiles, K_out tiles, F reduction tiles);
    # reduction axis last, f32 VMEM accumulator, pl.when init/finalize.
    k = pl.program_id(2)

    @pl.when(k == 0)
    def _init():
        acc_ref[...] = jnp.zeros_like(acc_ref)

    acc_ref[...] += jnp.dot(x_ref[...], w_ref[...],
                            preferred_element_type=jnp.float32)

    @pl.when(k == pl.num_programs(2) - 1)
    def _finalize():
        o_ref[...] = (acc_ref[...] + b_ref[...]).astype(o_ref.dtype)


# -------------------------- init-time parameter fold ----------------------- #

def fold_head_params(mean, std, w, b, compute_dtype=jnp.float32):
    """One-time (model-init) fold of the per-channel normalization into the head.

    ((x - m) * inv_std) @ w + b  ==  x @ (inv_std * w) + (b - (m * inv_std) @ w)

    Also zero-pads the output width to a lane-dense multiple of 128 and casts the
    folded weight to `compute_dtype` (bf16 for MXU peak; f32 for tight validation).
    Runs OUTSIDE the per-call hot path.
    """
    F, K = w.shape
    C = mean.size
    HW = F // C
    inv_std = (1.0 / std).reshape(C).astype(jnp.float32)       # (C,)
    mean_c = mean.reshape(C).astype(jnp.float32)                # (C,)
    s_flat = jnp.repeat(inv_std, HW)                            # (F,)  NCHW flatten order
    m_flat = jnp.repeat(mean_c, HW)                              # (F,)
    w_eff = (w.astype(jnp.float32) * s_flat[:, None])            # (F, K)
    b_eff = b.astype(jnp.float32) - (m_flat * s_flat)[None, :] @ w.astype(jnp.float32)

    Kp = max(128, ((K + 127) // 128) * 128)                      # lane-dense output width
    if Kp != K:
        w_eff = jnp.pad(w_eff, ((0, 0), (0, Kp - K)))
        b_eff = jnp.pad(b_eff, ((0, 0), (0, Kp - K)))

    w_eff = w_eff.astype(compute_dtype)
    b_eff = b_eff.astype(jnp.float32)                            # bias added post-accumulate
    return jax.block_until_ready(w_eff), jax.block_until_ready(b_eff), K


# ------------------------------- forward ----------------------------------- #

def _pick_tile(dim, candidates):
    for t in candidates:
        if dim >= t and dim % t == 0:
            return t
    return dim  # fall back to full extent (valid: block == full array dim)


@partial(jax.jit, static_argnames=("k_out",))
def preprocess_forward(x, w_eff, b_eff, *, k_out):
    """x: (N, C, H, W); w_eff: (F, Kp) folded+padded weights; b_eff: (1, Kp)."""
    N = x.shape[0]
    F, Kp = w_eff.shape
    itemsize = jnp.dtype(w_eff.dtype).itemsize

    x_flat = x.reshape(N, F).astype(w_eff.dtype)

    tm = _pick_tile(N, (256, 128, 64, 32, 16, 8))

    # Weight-resident single-reduction-step path: whole (F, Kp) weight stays in VMEM,
    # only the activation (M axis) is tiled. Eliminates all weight re-reads and all
    # reduction-step overhead.
    resident_bytes = (2 * (tm * F + F * Kp) * itemsize      # double-buffered x + w tiles
                      + 2 * Kp * 4                          # bias
                      + 2 * tm * Kp * 4)                    # output tile
    if resident_bytes <= _VMEM_PLAN_BUDGET:
        grid = (N // tm,)
        out_padded = pl.pallas_call(
            head_kernel_resident,
            out_shape=jax.ShapeDtypeStruct((N, Kp), jnp.float32),
            grid_spec=pltpu.PrefetchScalarGridSpec(
                num_scalar_prefetch=0,
                grid=grid,
                in_specs=[
                    pl.BlockSpec((tm, F), lambda i: (i, 0)),    # x tile
                    pl.BlockSpec((F, Kp), lambda i: (0, 0)),    # resident folded weight
                    pl.BlockSpec((1, Kp), lambda i: (0, 0)),    # folded bias
                ],
                out_specs=pl.BlockSpec((tm, Kp), lambda i: (i, 0)),
            ),
            compiler_params=pltpu.CompilerParams(
                dimension_semantics=("parallel",),
                vmem_limit_bytes=_VMEM_LIMIT_BYTES,
            ),
            cost_estimate=pl.CostEstimate(
                flops=2 * N * F * Kp,
                transcendentals=0,
                bytes_accessed=(N * F + F * Kp) * itemsize + Kp * 4 + N * Kp * 4,
            ),
        )(x_flat, w_eff, b_eff)
    else:
        # Tiled fallback for large heads. Tile caps chosen to fit v7x's 64 MiB VMEM.
        tn = _pick_tile(Kp, (256, 128))
        tk = _pick_tile(F, (2048, 1024, 512, 256, 128))
        grid = (N // tm, Kp // tn, F // tk)
        out_padded = pl.pallas_call(
            head_kernel_tiled,
            out_shape=jax.ShapeDtypeStruct((N, Kp), jnp.float32),
            grid_spec=pltpu.PrefetchScalarGridSpec(
                num_scalar_prefetch=0,
                grid=grid,
                in_specs=[
                    pl.BlockSpec((tm, tk), lambda i, j, k: (i, k)),
                    pl.BlockSpec((tk, tn), lambda i, j, k: (k, j)),
                    pl.BlockSpec((1, tn), lambda i, j, k: (0, j)),
                ],
                out_specs=pl.BlockSpec((tm, tn), lambda i, j, k: (i, j)),
                scratch_shapes=[pltpu.VMEM((tm, tn), jnp.float32)],
            ),
            compiler_params=pltpu.CompilerParams(
                dimension_semantics=("parallel", "parallel", "arbitrary"),
                vmem_limit_bytes=_VMEM_LIMIT_BYTES,
            ),
            cost_estimate=pl.CostEstimate(
                flops=2 * N * F * Kp,
                transcendentals=0,
                # grid-aware: x re-streamed per output-column tile, w re-streamed per row tile
                bytes_accessed=(N * F * (Kp // tn) + F * Kp * (N // tm)) * itemsize
                               + Kp * (N // tm) * 4 + N * Kp * 4,
            ),
        )(x_flat, w_eff, b_eff)

    return out_padded[:, :k_out] if Kp != k_out else out_padded


# ------------------------------ main --------------------------------------- #

if __name__ == "__main__":
    N, C, H, W = 2, 3, 16, 16   # 3 channels required by the registered mean/std buffers
    K = 32                      # synthetic head output width (padded to 128 internally)

    key = jax.random.PRNGKey(0)
    kx, kw, kb = jax.random.split(key, 3)

    x = jax.random.uniform(kx, (N, C, H, W), dtype=jnp.float32)

    # buffers exactly as registered in the PyTorch module
    mean = jnp.array([0.485, 0.456, 0.406], dtype=jnp.float32).reshape(1, 3, 1, 1)
    std = jnp.array([0.229, 0.224, 0.225], dtype=jnp.float32).reshape(1, 3, 1, 1)

    # TODO(synk): base_model is undefined in the reference __init__; a deterministic
    # synthetic linear head (flatten -> matmul + bias) stands in for it.
    F = C * H * W
    w = jax.random.normal(kw, (F, K), dtype=jnp.float32) * 0.02
    b = jax.random.normal(kb, (1, K), dtype=jnp.float32) * 0.01

    # --- model init (runs once, outside the hot path): fold norm into the head ---
    # compute_dtype=jnp.bfloat16 is the production setting on v6e/v7x; f32 kept here
    # so the 1e-4 reference check below holds.
    w_eff, b_eff, k_out = fold_head_params(mean, std, w, b, compute_dtype=jnp.float32)

    # --- hot path: single Pallas kernel per forward call ---
    out = preprocess_forward(x, w_eff, b_eff, k_out=k_out)
    out = jax.block_until_ready(out)

    # reference check in plain JAX (unfused order)
    ref = ((x - mean) / std).reshape(N, F) @ w + b
    assert out.shape == (N, K)
    assert jnp.allclose(out, ref, atol=1e-4, rtol=1e-4)

    print("KERNEL_OK")
</pallas_src>

<mosaic_0001>
module attributes {stable_mosaic.version = 11 : i64} {
  func.func @head_kernel_resident(%arg0: i32, %arg1: memref<2x768xf32, #tpu.memory_space<vmem>>, %arg2: memref<768x128xf32, #tpu.memory_space<vmem>>, %arg3: memref<1x128xf32, #tpu.memory_space<vmem>>, %arg4: memref<2x128xf32, #tpu.memory_space<vmem>>) attributes {dimension_semantics = [#tpu.dimension_semantics<parallel>], iteration_bounds = array<i64: 1>, scalar_prefetch = 0 : i64, scratch_operands = 0 : i64, tpu.core_type = #tpu.core_type<tc>, window_params = [{transform_indices = @transform_0, window_bounds = array<i64: 2, 768>}, {pipeline_mode = #tpu.pipeline_mode<synchronous>, transform_indices = @transform_1, window_bounds = array<i64: 768, 128>}, {pipeline_mode = #tpu.pipeline_mode<synchronous>, transform_indices = @transform_2, window_bounds = array<i64: 1, 128>}, {transform_indices = @transform_3, window_bounds = array<i64: 2, 128>}]} {
    %c0 = arith.constant 0 : index
    %c0_0 = arith.constant 0 : index
    %0 = vector.load %arg1[%c0, %c0_0] : memref<2x768xf32, #tpu.memory_space<vmem>>, vector<2x768xf32>
    %c0_1 = arith.constant 0 : index
    %c0_2 = arith.constant 0 : index
    %1 = vector.load %arg2[%c0_1, %c0_2] : memref<768x128xf32, #tpu.memory_space<vmem>>, vector<768x128xf32>
    %cst = arith.constant dense<0.000000e+00> : vector<2x128xf32>
    %2 = tpu.matmul %0, %1, %cst {dimension_numbers = #tpu.dot_dimension_numbers<[1], [0], [0], [1], [0, 0, 1, 1], [], []>} : vector<2x768xf32>, vector<768x128xf32>, vector<2x128xf32> -> vector<2x128xf32>
    %c0_3 = arith.constant 0 : index
    %c0_4 = arith.constant 0 : index
    %3 = vector.load %arg3[%c0_3, %c0_4] : memref<1x128xf32, #tpu.memory_space<vmem>>, vector<1x128xf32>
    %4 = vector.broadcast %3 : vector<1x128xf32> to vector<2x128xf32>
    %5 = arith.addf %2, %4 : vector<2x128xf32>
    %c0_5 = arith.constant 0 : index
    %c0_6 = arith.constant 0 : index
    %6 = vector.load %arg4[%c0_5, %c0_6] : memref<2x128xf32, #tpu.memory_space<vmem>>, vector<2x128xf32>
    tpu.vector_store %arg4[%c0_5, %c0_6], %5 {strides = array<i32>} : memref<2x128xf32, #tpu.memory_space<vmem>>, vector<2x128xf32>,
    return
  }
  func.func @transform_0(%arg0: i32) -> (i32, i32) {
    %c0_i32 = arith.constant 0 : i32
    %c0_i32_0 = arith.constant 0 : i32
    return %arg0, %c0_i32 : i32, i32
  }
  func.func @transform_1(%arg0: i32) -> (i32, i32) {
    %c0_i32 = arith.constant 0 : i32
    %c0_i32_0 = arith.constant 0 : i32
    %c0_i32_1 = arith.constant 0 : i32
    return %c0_i32, %c0_i32_0 : i32, i32
  }
  func.func @transform_2(%arg0: i32) -> (i32, i32) {
    %c0_i32 = arith.constant 0 : i32
    %c0_i32_0 = arith.constant 0 : i32
    %c0_i32_1 = arith.constant 0 : i32
    return %c0_i32, %c0_i32_0 : i32, i32
  }
  func.func @transform_3(%arg0: i32) -> (i32, i32) {
    %c0_i32 = arith.constant 0 : i32
    %c0_i32_0 = arith.constant 0 : i32
    return %arg0, %c0_i32 : i32, i32
  }
}

</mosaic_0001>

<bundles_post_ra>
// kernel: preprocess_forward.1
= control target key start
LH: loop header
LB: loop body
LE: loop exit
PB: predicated region body
PF: predicated region fallthrough
CT: control target
= control target key end

     0   :  { %8 = vsyncpa [#allocation3], 0  ;;  %s595_s0 = inlined_call_operand.vmem [shape: f32[2,768], index: 0, kind: input, shape index: {}]   ;;  %s596_s1 = inlined_call_operand.hbm [shape: f32[768,128], index: 1, kind: input, shape index: {}]   ;;  %s597_s2 = inlined_call_operand.vmem [shape: f32[1,128], index: 2, kind: input, shape index: {}]   ;;  %s598_s3 = inlined_call_operand.hbm [shape: f32[2,128], index: 3, kind: output, shape index: {}]  }
   0x1   :  { %9 = vsyncpa [#allocation4], 0  ;;  %s550_s12 = smov [#allocation2]  }
   0x2   :  { %s17_s13 = sshll.u32 %s550_s12, 4  ;;  %s18_s13 = int_to_ptr.vmem [resolvable:$true] %s17_s13 }
   0x3   :  { %s514_s14 = scalar_lea.vmem %s18_s13, 12288  ;;  %p519_p1 = scmp.lt.s32.totalorder %s18_s13, %s18_s13 }
   0x4   :  { %p515_p0 = scmp.ne.s32.totalorder %s18_s13, %s514_s14  ;;  %p520_p2 = scmp.lt.s32.totalorder %s514_s14, %s514_s14 }
   0x6   :  { %p521_p3 = por %p520_p2, %p519_p1 }
   0x8   :  { %p522_p4 = pnand %p521_p3, %p515_p0 }
   0xa   :  { %525 = shalt.err (!%p522_p4)
}
   0xb   :  { %s551_s15 = smov 128   ;;  %s552_s16 = smov 8  }
   0xc   :  { %23 = dma.hbm_to_vmem [thread:$0]  %s596_s1, 12288, %s18_s13, [#allocation3], %s551_s15, %s551_s15, %s552_s16  }
   0xd   :  { %546 = dma.done.wait [#allocation3], 12288  }
   0xe   :  { %547 = vsyncadd [#allocation3], 4294955008  ;;  %v62_v0 = vld [vmem:[#allocation2 + $0xf8] sm:$0xff]  ;;  %v61_v2 = vld [vmem:[#allocation2 + $0xf0] sm:$0xff]  ;;  %v553_v27 = vmov 1983009808   ;;  %v140_v29 = vlaneseq }
   0xf   :  { %v46_v1 = vld [vmem:[#allocation2 + $0x78] sm:$0xff]  ;;  %395 = vmatprep.subr.mxu0 %v62_v0  ;;  %v45_v4 = vld [vmem:[#allocation2 + $0x70] sm:$0xff]  ;;  %v60_v6 = vld [vmem:[#allocation2 + $0xe8] sm:$0xff]  ;;  %v138_v28 = vunpack.c.l.s4 %v553_v27  ;;  %s554_s23 = smov [#allocation5]  }
  0x10   :  { %v94_v3 = vld [vmem:[#allocation2 + $0x1f8] sm:$0xff]  ;;  %396 = vmatpush3.msra.mxu0 %v46_v1  ;;  %v93_v7 = vld [vmem:[#allocation2 + $0x1f0] sm:$0xff]  ;;  %v44_v8 = vld [vmem:[#allocation2 + $0x68] sm:$0xff]  ;;  %v141_v39 = vshrl.u32 %v140_v29, 7  ;;  %s384_s24 = sshll.u32 %s554_s23, 4  ;;  %s385_s24 = int_to_ptr.vmem [resolvable:$true] %s384_s24 }
  0x11   :  { %v78_v5 = vld [vmem:[#allocation2 + $0x178] sm:$0xff]  ;;  %430 = vmatprep.subr.mxu1 %v94_v3  ;;  %397 = vmatprep.subr.mxu0 %v61_v2  ;;  %v77_v9 = vld [vmem:[#allocation2 + $0x170] sm:$0xff]  ;;  %v92_v10 = vld [vmem:[#allocation2 + $0x1e8] sm:$0xff]  ;;  %v139_v38 = vunpack.c.0.s8 %v138_v28  ;;  %s526_s25 = scalar_lea.vmem %s385_s24, 32  ;;  %p531_p6 = scmp.lt.s32.totalorder %s385_s24, %s385_s24 }
  0x12   :  { %431 = vmatpush3.msra.mxu1 %v78_v5  ;;  %398 = vmatpush3.msra.mxu0 %v45_v4  ;;  %v59_v11 = vld [vmem:[#allocation2 + $0xe0] sm:$0xff]  ;;  %v76_v12 = vld [vmem:[#allocation2 + $0x168] sm:$0xff]  ;;  %v58_v15 = vld [vmem:[#allocation2 + $0xd8] sm:$0xff]  ;;  %p527_p5 = scmp.ne.s32.totalorder %s385_s24, %s526_s25  ;;  %p532_p7 = scmp.lt.s32.totalorder %s526_s25, %s526_s25 }
  0x13   :  { %432 = vmatprep.subr.mxu1 %v93_v7  ;;  %399 = vmatprep.subr.mxu0 %v60_v6  ;;  %v43_v13 = vld [vmem:[#allocation2 + $0x60] sm:$0xff]  ;;  %v42_v17 = vld [vmem:[#allocation2 + $0x58] sm:$0xff]  ;;  %v57_v19 = vld [vmem:[#allocation2 + $0xd0] sm:$0xff]  ;;  %v142_v48 = vsub.s32 %v139_v38, %v141_v39 }
  0x14   :  { %433 = vmatpush3.msra.mxu1 %v77_v9  ;;  %v91_v14 = vld [vmem:[#allocation2 + $0x1e0] sm:$0xff]  ;;  %400 = vmatpush3.msra.mxu0 %v44_v8  ;;  %v90_v18 = vld [vmem:[#allocation2 + $0x1d8] sm:$0xff]  ;;  %v41_v21 = vld [vmem:[#allocation2 + $0x50] sm:$0xff]  ;;  %p533_p8 = por %p532_p7, %p531_p6 }
  0x15   :  { %434 = vmatprep.subr.mxu1 %v92_v10  ;;  %v75_v16 = vld [vmem:[#allocation2 + $0x160] sm:$0xff]  ;;  %401 = vmatprep.subr.mxu0 %v59_v11  ;;  %v74_v20 = vld [vmem:[#allocation2 + $0x158] sm:$0xff]  ;;  %v89_v22 = vld [vmem:[#allocation2 + $0x1d0] sm:$0xff] }
  0x16   :  { %435 = vmatpush3.msra.mxu1 %v76_v12  ;;  %402 = vmatpush3.msra.mxu0 %v43_v13  ;;  %v56_v23 = vld [vmem:[#allocation2 + $0xc8] sm:$0xff]  ;;  %v73_v24 = vld [vmem:[#allocation2 + $0x150] sm:$0xff]  ;;  %v55_v30 = vld [vmem:[#allocation2 + $0xc0] sm:$0xff]  ;;  %p534_p9 = pnand %p533_p8, %p527_p5 }
  0x17   :  { %436 = vmatprep.subr.mxu1 %v91_v14  ;;  %403 = vmatprep.subr.mxu0 %v58_v15  ;;  %v40_v25 = vld [vmem:[#allocation2 + $0x48] sm:$0xff]  ;;  %v39_v32 = vld [vmem:[#allocation2 + $0x40] sm:$0xff]  ;;  %v54_v34 = vld [vmem:[#allocation2 + $0xb8] sm:$0xff] }
  0x18   :  { %437 = vmatpush3.msra.mxu1 %v75_v16  ;;  %404 = vmatpush3.msra.mxu0 %v42_v17  ;;  %v88_v26 = vld [vmem:[#allocation2 + $0x1c8] sm:$0xff]  ;;  %v87_v33 = vld [vmem:[#allocation2 + $0x1c0] sm:$0xff]  ;;  %v38_v36 = vld [vmem:[#allocation2 + $0x38] sm:$0xff] }
  0x19   :  { %438 = vmatprep.subr.mxu1 %v90_v18  ;;  %405 = vmatprep.subr.mxu0 %v57_v19  ;;  %v72_v31 = vld [vmem:[#allocation2 + $0x148] sm:$0xff]  ;;  %v71_v35 = vld [vmem:[#allocation2 + $0x140] sm:$0xff]  ;;  %v86_v37 = vld [vmem:[#allocation2 + $0x1b8] sm:$0xff] }
  0x1a   :  { %439 = vmatpush3.msra.mxu1 %v74_v20  ;;  %406 = vmatpush3.msra.mxu0 %v41_v21  ;;  %v53_v40 = vld [vmem:[#allocation2 + $0xb0] sm:$0xff]  ;;  %v70_v41 = vld [vmem:[#allocation2 + $0x138] sm:$0xff]  ;;  %v52_v44 = vld [vmem:[#allocation2 + $0xa8] sm:$0xff] }
  0x1b   :  { %440 = vmatprep.subr.mxu1 %v89_v22  ;;  %407 = vmatprep.subr.mxu0 %v56_v23  ;;  %v37_v42 = vld [vmem:[#allocation2 + $0x30] sm:$0xff]  ;;  %v36_v46 = vld [vmem:[#allocation2 + $0x28] sm:$0xff]  ;;  %v51_v49 = vld [vmem:[#allocation2 + $0xa0] sm:$0xff] }
  0x1c   :  { %441 = vmatpush3.msra.mxu1 %v73_v24  ;;  %408 = vmatpush3.msra.mxu0 %v40_v25  ;;  %v85_v43 = vld [vmem:[#allocation2 + $0x1b0] sm:$0xff]  ;;  %v84_v47 = vld [vmem:[#allocation2 + $0x1a8] sm:$0xff]  ;;  %v29_v51 = vld [vmem:[%s595_s0] sm:$0xff] }
  0x1d   :  { %442 = vmatprep.subr.mxu1 %v88_v26  ;;  %409 = vmatprep.subr.mxu0 %v55_v30  ;;  %v69_v45 = vld [vmem:[#allocation2 + $0x130] sm:$0xff]  ;;  %v68_v50 = vld [vmem:[#allocation2 + $0x128] sm:$0xff]  ;;  %v35_v52 = vld [vmem:[#allocation2 + $0x20] sm:$0xff]  ;;  %v143_v58 = vrot.slane %v29_v51, %v142_v48  ;;  %v136_v59 = vcombine.high %v29_v51, %v29_v51 }
  0x1e   :  { %443 = vmatpush3.msra.mxu1 %v72_v31  ;;  %410 = vmatpush3.msra.mxu0 %v39_v32  ;;  %v83_v53 = vld [vmem:[#allocation2 + $0x1a0] sm:$0xff]  ;;  %v50_v54 = vld [vmem:[#allocation2 + $0x98] sm:$0xff]  ;;  %v49_v60 = vld [vmem:[#allocation2 + $0x90] sm:$0xff] }
  0x1f   :  { %444 = vmatprep.subr.mxu1 %v87_v33  ;;  %411 = vmatprep.subr.mxu0 %v54_v34  ;;  %v67_v55 = vld [vmem:[#allocation2 + $0x120] sm:$0xff]  ;;  %v34_v56 = vld [vmem:[#allocation2 + $0x18] sm:$0xff]  ;;  %v33_v62 = vld [vmem:[#allocation2 + $0x10] sm:$0xff]  ;;  %v151_v4 = vcombine.high %v143_v58, %v143_v58  ;;  %v150_v5 = vrot.slane %v136_v59, %v142_v48 }
  0x20   :  { %445 = vmatpush3.msra.mxu1 %v71_v35  ;;  %412 = vmatpush3.msra.mxu0 %v38_v36  ;;  %v82_v57 = vld [vmem:[#allocation2 + $0x198] sm:$0xff]  ;;  %v81_v63 = vld [vmem:[#allocation2 + $0x190] sm:$0xff]  ;;  %v48_v0 = vld [vmem:[#allocation2 + $0x88] sm:$0xff] }
  0x21   :  { %446 = vmatprep.subr.mxu1 %v86_v37  ;;  %413 = vmatprep.subr.mxu0 %v53_v40  ;;  %v66_v61 = vld [vmem:[#allocation2 + $0x118] sm:$0xff]  ;;  %v65_v1 = vld [vmem:[#allocation2 + $0x110] sm:$0xff]  ;;  %v32_v2 = vld [vmem:[#allocation2 + $0x8] sm:$0xff]  ;;  %v152_v12 = vcombine.high %v150_v5, %v150_v5 }
  0x22   :  { %447 = vmatpush3.msra.mxu1 %v70_v41  ;;  %414 = vmatpush3.msra.mxu0 %v37_v42  ;;  %v80_v3 = vld [vmem:[#allocation2 + $0x188] sm:$0xff]  ;;  %v47_v6 = vld [vmem:[#allocation2 + $0x80] sm:$0xff]  ;;  %v126_v10 = vld [vmem:[#allocation2 + $0x2f8] sm:$0xff] }
  0x23   :  { %448 = vmatprep.subr.mxu1 %v85_v43  ;;  %415 = vmatprep.subr.mxu0 %v52_v44  ;;  %v31_v7 = vld [vmem:[#allocation2] sm:$0xff]  ;;  %v64_v8 = vld [vmem:[#allocation2 + $0x108] sm:$0xff]  ;;  %v110_v13 = vld [vmem:[#allocation2 + $0x278] sm:$0xff] }
  0x24   :  { %449 = vmatpush3.msra.mxu1 %v69_v45  ;;  %416 = vmatpush3.msra.mxu0 %v36_v46  ;;  %v79_v9 = vld [vmem:[#allocation2 + $0x180] sm:$0xff]  ;;  %v584_v14 = vld.sshfl [vmem:[%s595_s0 + $0x8] sm:$0x33 pattern:$0x76325410]  ;;  %v125_v15 = vld [vmem:[#allocation2 + $0x2f0] sm:$0xff] }
  0x25   :  { %450 = vmatprep.subr.mxu1 %v84_v47  ;;  %417 = vmatprep.subr.mxu0 %v51_v49  ;;  %v63_v11 = vld [vmem:[#allocation2 + $0x100] sm:$0xff]  ;;  %v160_v16 = vcombine.high %v584_v14, %v584_v14  ;;  %v109_v17 = vld [vmem:[#allocation2 + $0x270] sm:$0xff]  ;;  %v124_v18 = vld [vmem:[#allocation2 + $0x2e8] sm:$0xff] }
  0x26   :  { %451 = vmatpush3.msra.mxu1 %v68_v50  ;;  %418 = vmatpush3.msra.mxu0 %v35_v52  ;;  %v108_v19 = vld [vmem:[#allocation2 + $0x268] sm:$0xff]  ;;  %v123_v20 = vld [vmem:[#allocation2 + $0x2e0] sm:$0xff]  ;;  %v122_v22 = vld [vmem:[#allocation2 + $0x2d8] sm:$0xff] }
  0x27   :  { %452 = vmatprep.subr.mxu1 %v83_v53  ;;  %419 = vmatprep.subr.mxu0 %v50_v54  ;;  %v107_v21 = vld [vmem:[#allocation2 + $0x260] sm:$0xff]  ;;  %v106_v23 = vld [vmem:[#allocation2 + $0x258] sm:$0xff]  ;;  %v121_v24 = vld [vmem:[#allocation2 + $0x2d0] sm:$0xff] }
  0x28   :  { %453 = vmatpush3.msra.mxu1 %v67_v55  ;;  %420 = vmatpush3.msra.mxu0 %v34_v56  ;;  %v105_v25 = vld [vmem:[#allocation2 + $0x250] sm:$0xff]  ;;  %v120_v26 = vld [vmem:[#allocation2 + $0x2c8] sm:$0xff]  ;;  %v119_v28 = vld [vmem:[#allocation2 + $0x2c0] sm:$0xff] }
  0x29   :  { %454 = vmatprep.subr.mxu1 %v82_v57  ;;  %421 = vmatprep.subr.mxu0 %v49_v60  ;;  %v104_v27 = vld [vmem:[#allocation2 + $0x248] sm:$0xff]  ;;  %v103_v29 = vld [vmem:[#allocation2 + $0x240] sm:$0xff]  ;;  %v118_v30 = vld [vmem:[#allocation2 + $0x2b8] sm:$0xff] }
  0x2a   :  { %455 = vmatpush3.msra.mxu1 %v66_v61  ;;  %422 = vmatpush3.msra.mxu0 %v33_v62  ;;  %v102_v31 = vld [vmem:[#allocation2 + $0x238] sm:$0xff]  ;;  %v117_v32 = vld [vmem:[#allocation2 + $0x2b0] sm:$0xff]  ;;  %v116_v34 = vld [vmem:[#allocation2 + $0x2a8] sm:$0xff] }
  0x2b   :  { %456 = vmatprep.subr.mxu1 %v81_v63  ;;  %423 = vmatprep.subr.mxu0 %v48_v0  ;;  %v101_v33 = vld [vmem:[#allocation2 + $0x230] sm:$0xff]  ;;  %v100_v35 = vld [vmem:[#allocation2 + $0x228] sm:$0xff]  ;;  %v115_v36 = vld [vmem:[#allocation2 + $0x2a0] sm:$0xff] }
  0x2c   :  { %457 = vmatpush3.msra.mxu1 %v65_v1  ;;  %424 = vmatpush3.msra.mxu0 %v32_v2  ;;  %v99_v37 = vld [vmem:[#allocation2 + $0x220] sm:$0xff]  ;;  %v114_v38 = vld [vmem:[#allocation2 + $0x298] sm:$0xff]  ;;  %v113_v40 = vld [vmem:[#allocation2 + $0x290] sm:$0xff] }
  0x2d   :  { %458 = vmatprep.subr.mxu1 %v80_v3  ;;  %425 = vmatprep.subr.mxu0 %v47_v6  ;;  %v98_v39 = vld [vmem:[#allocation2 + $0x218] sm:$0xff]  ;;  %v97_v41 = vld [vmem:[#allocation2 + $0x210] sm:$0xff]  ;;  %v112_v42 = vld [vmem:[#allocation2 + $0x288] sm:$0xff] }
  0x2e   :  { %231 = vmatprep.mubr.f32.mxu0 %v151_v4  ;;  %426 = vmatpush3.msra.mxu0 %v31_v7  ;;  %v96_v43 = vld [vmem:[#allocation2 + $0x208] sm:$0xff]  ;;  %v111_v44 = vld [vmem:[#allocation2 + $0x280] sm:$0xff] }
  0x2f   :  { %459 = vmatpush3.msra.mxu1 %v64_v8  ;;  %232 = vmatmul.mubr.f32.vlgmr.msra.gmra.mxu0 %v143_v58  ;;  %v95_v45 = vld [vmem:[#allocation2 + $0x200] sm:$0xff] }
  0x30   :  { %460 = vmatprep.subr.mxu1 %v79_v9  ;;  %465 = vmatprep.subr.mxu0 %v126_v10  ;;  %v393_v50 = vld [vmem:[%s597_s2] ss:$0 sm:$0xff] }
  0x31   :  { %461 = vmatpush3.msra.mxu1 %v63_v11  ;;  %301 = vmatprep.mubr.f32.mxu1 %v152_v12 }
  0x32   :  { %466 = vmatpush3.msra.mxu0 %v110_v13  ;;  %302 = vmatmul.mubr.f32.vlgmr.msra.gmra.mxu1 %v150_v5 }
  0x33   :  { %467 = vmatprep.subr.mxu0 %v125_v15  ;;  %371 = vmatprep.mubr.f32.mxu0 %v160_v16 }
  0x34   :  { %468 = vmatpush3.msra.mxu0 %v109_v17 }
  0x35   :  { %469 = vmatprep.subr.mxu0 %v124_v18 }
  0x36   :  { %470 = vmatpush3.msra.mxu0 %v108_v19 }
  0x37   :  { %471 = vmatprep.subr.mxu0 %v123_v20 }
  0x38   :  { %472 = vmatpush3.msra.mxu0 %v107_v21 }
  0x39   :  { %473 = vmatprep.subr.mxu0 %v122_v22 }
  0x3a   :  { %474 = vmatpush3.msra.mxu0 %v106_v23 }
  0x3b   :  { %475 = vmatprep.subr.mxu0 %v121_v24 }
  0x3c   :  { %476 = vmatpush3.msra.mxu0 %v105_v25 }
  0x3d   :  { %477 = vmatprep.subr.mxu0 %v120_v26 }
  0x3e   :  { %478 = vmatpush3.msra.mxu0 %v104_v27 }
  0x3f   :  { %479 = vmatprep.subr.mxu0 %v119_v28 }
  0x40   :  { %480 = vmatpush3.msra.mxu0 %v103_v29 }
  0x41   :  { %481 = vmatprep.subr.mxu0 %v118_v30 }
  0x42   :  { %482 = vmatpush3.msra.mxu0 %v102_v31 }
  0x43   :  { %483 = vmatprep.subr.mxu0 %v117_v32 }
  0x44   :  { %484 = vmatpush3.msra.mxu0 %v101_v33 }
  0x45   :  { %485 = vmatprep.subr.mxu0 %v116_v34 }
  0x46   :  { %486 = vmatpush3.msra.mxu0 %v100_v35 }
  0x47   :  { %487 = vmatprep.subr.mxu0 %v115_v36 }
  0x48   :  { %488 = vmatpush3.msra.mxu0 %v99_v37 }
  0x49   :  { %489 = vmatprep.subr.mxu0 %v114_v38 }
  0x4a   :  { %490 = vmatpush3.msra.mxu0 %v98_v39 }
  0x4b   :  { %491 = vmatprep.subr.mxu0 %v113_v40 }
  0x4c   :  { %492 = vmatpush3.msra.mxu0 %v97_v41 }
  0x4d   :  { %493 = vmatprep.subr.mxu0 %v112_v42 }
  0x4e   :  { %494 = vmatpush3.msra.mxu0 %v96_v43 }
  0x4f   :  { %495 = vmatprep.subr.mxu0 %v111_v44 }
  0x50   :  { %496 = vmatpush3.msra.mxu0 %v95_v45 }
  0x51   :  { %372 = vmatmul.mubr.f32.vlgmr.msra.gmra.mxu0 %v584_v14 }
  0xef   :  { %v427_v46 = vpop.f32.mrf.mxu0 }
  0xf1   :  { %v428_v47 = vpop.f32.mrf.mxu0 }
  0xf2   :  { %v462_v48 = vpop.f32.mrf.mxu1  ;;  %v429_v49 = vadd.f32 %v428_v47, %v427_v46 }
  0xf4   :  { %v463_v51 = vpop.f32.mrf.mxu1  ;;  %v234_v52 = vadd.f32 %v429_v49, %v393_v50 }
  0xf5   :  { %v464_v53 = vadd.f32 %v463_v51, %v462_v48 }
  0xf7   :  { %v304_v56 = vadd.f32 %v464_v53, %v234_v52 }
 0x111   :  { %v497_v54 = vpop.f32.mrf.mxu0 }
 0x113   :  { %v498_v55 = vpop.f32.mrf.mxu0 }
 0x114   :  { %v499_v57 = vadd.f32 %v498_v55, %v497_v54 }
 0x116   :  { %v374_v58 = vadd.f32 %v499_v57, %v304_v56 }
 0x118   :  { %377 = vst [vmem:[#allocation5] sm:$0x3] %v374_v58 }
 0x119   :  { %537 = shalt.err (!%p534_p9)
}
 0x11a   :  { %387 = dma.vmem_to_hbm [thread:$0]  %s385_s24, 32, %s598_s3, [#allocation4]  }
 0x11b   :  { %548 = dma.done.wait [#allocation4], 32  }
 0x11c   :  { %549 = vsyncadd [#allocation4], 4294967264 }
 0x11d   :  { %391 = vsyncpa [#allocation3], 1 }
 0x11e   :  { %392 = vsyncpa [#allocation4], 1 }

</bundles_post_ra>
